<compile_context>
chip_gen: v7x
topology: tpu7x:2x2x1
jax: 0.10.0
libtpu: 0.0.40
codegen_flags: <defaults>
</compile_context>

<pallas_src>
import functools
import math

import jax
import jax.numpy as jnp
from jax.experimental import pallas as pl
from jax.experimental.pallas import tpu as pltpu


def _round_up(x, m):
    return ((x + m - 1) // m) * m


# ----------------------------------------------------------------------------
# Pallas kernels: fused matmul + folded-BN bias (+ residual) (+ ReLU) epilogue
# ----------------------------------------------------------------------------
def _mm_kernel(a_ref, w_ref, b_ref, o_ref, *, relu):
    acc = jnp.dot(a_ref[...], w_ref[...], preferred_element_type=jnp.float32)
    acc = acc + b_ref[...]
    if relu:
        acc = jnp.maximum(acc, 0.0)
    o_ref[...] = acc.astype(o_ref.dtype)


def _mm_res_kernel(a_ref, w_ref, b_ref, r_ref, o_ref, *, relu):
    acc = jnp.dot(a_ref[...], w_ref[...], preferred_element_type=jnp.float32)
    acc = acc + b_ref[...] + r_ref[...].astype(jnp.float32)
    if relu:
        acc = jnp.maximum(acc, 0.0)
    o_ref[...] = acc.astype(o_ref.dtype)


def _tile_m(M):
    """Pick (TM, Mp): big M -> 512-row tiles (grid >= 2); tiny M -> one tile."""
    if M >= 1024:
        return 512, _round_up(M, 512)
    Mp = _round_up(max(M, 16), 16)
    return Mp, Mp


def _vmem_limit(TM, K, N, has_res):
    a_b = TM * K * 2 * 2        # bf16, double-buffered
    w_b = K * N * 2 * 2
    o_b = TM * N * 2 * 2
    r_b = TM * N * 2 * 2 if has_res else 0
    acc = TM * N * 4
    need = 2 * (a_b + w_b + o_b + r_b + acc) + (8 << 20)
    return int(min(max(need, 32 << 20), 56 << 20))   # <= 56 MiB (v7x has 64 MiB)


@functools.partial(jax.jit, static_argnames=("relu",))
def _fused_conv_mm(a, w, bias, *, relu):
    """out = [relu](a @ w + bias); a:(M,K) bf16, w:(K,N) bf16, bias:(1,N) f32."""
    M, K = a.shape
    N = w.shape[1]
    TM, Mp = _tile_m(M)
    if Mp > M:
        a = jnp.pad(a, ((0, Mp - M), (0, 0)))
    out = pl.pallas_call(
        functools.partial(_mm_kernel, relu=relu),
        out_shape=jax.ShapeDtypeStruct((Mp, N), jnp.bfloat16),
        grid_spec=pltpu.PrefetchScalarGridSpec(
            num_scalar_prefetch=0,
            grid=(Mp // TM,),
            in_specs=[
                pl.BlockSpec((TM, K), lambda i: (i, 0)),   # patches tile
                pl.BlockSpec((K, N), lambda i: (0, 0)),    # full weights (resident)
                pl.BlockSpec((1, N), lambda i: (0, 0)),    # folded BN bias
            ],
            out_specs=pl.BlockSpec((TM, N), lambda i: (i, 0)),
        ),
        compiler_params=pltpu.CompilerParams(
            dimension_semantics=("parallel",),
            vmem_limit_bytes=_vmem_limit(TM, K, N, False),
        ),
    )(a, w, bias)
    return out[:M] if Mp > M else out


@functools.partial(jax.jit, static_argnames=("relu",))
def _fused_conv_mm_res(a, w, bias, res, *, relu):
    """out = [relu](a @ w + bias + res); res:(M,N) bf16."""
    M, K = a.shape
    N = w.shape[1]
    TM, Mp = _tile_m(M)
    if Mp > M:
        a = jnp.pad(a, ((0, Mp - M), (0, 0)))
        res = jnp.pad(res, ((0, Mp - M), (0, 0)))
    out = pl.pallas_call(
        functools.partial(_mm_res_kernel, relu=relu),
        out_shape=jax.ShapeDtypeStruct((Mp, N), jnp.bfloat16),
        grid_spec=pltpu.PrefetchScalarGridSpec(
            num_scalar_prefetch=0,
            grid=(Mp // TM,),
            in_specs=[
                pl.BlockSpec((TM, K), lambda i: (i, 0)),   # patches tile
                pl.BlockSpec((K, N), lambda i: (0, 0)),    # full weights (resident)
                pl.BlockSpec((1, N), lambda i: (0, 0)),    # folded BN bias
                pl.BlockSpec((TM, N), lambda i: (i, 0)),   # residual tile
            ],
            out_specs=pl.BlockSpec((TM, N), lambda i: (i, 0)),
        ),
        compiler_params=pltpu.CompilerParams(
            dimension_semantics=("parallel",),
            vmem_limit_bytes=_vmem_limit(TM, K, N, True),
        ),
    )(a, w, bias, res)
    return out[:M] if Mp > M else out


# ----------------------------------------------------------------------------
# im2col glue (plain JAX): NHWC -> (B, Ho, Wo, kh*kw*C) patches
# ----------------------------------------------------------------------------
def im2col(x, kh, kw, stride, pad, dilation):
    B, H, W, C = x.shape
    Ho = (H + 2 * pad - dilation * (kh - 1) - 1) // stride + 1
    Wo = (W + 2 * pad - dilation * (kw - 1) - 1) // stride + 1
    xp = jnp.pad(x, ((0, 0), (pad, pad), (pad, pad), (0, 0)))
    taps = []
    for ki in range(kh):
        for kj in range(kw):
            i0 = ki * dilation
            j0 = kj * dilation
            sl = xp[:, i0:i0 + (Ho - 1) * stride + 1:stride,
                    j0:j0 + (Wo - 1) * stride + 1:stride, :]
            taps.append(sl)
    patches = jnp.stack(taps, axis=3)  # (B, Ho, Wo, kh*kw, C)
    return patches.reshape(B, Ho, Wo, kh * kw * C), Ho, Wo


def conv_bn(x, p, relu=False, residual=None):
    """x NHWC bf16 -> conv(+folded BN)(+residual)(+relu) via the Pallas kernel."""
    patches, Ho, Wo = im2col(x, p["kh"], p["kw"], p["stride"], p["pad"], p["dil"])
    B = x.shape[0]
    M = B * Ho * Wo
    K = patches.shape[-1]
    N = p["w"].shape[-1]
    a = patches.reshape(M, K)
    if p["kpad"]:                      # only the very first conv (K=27 -> 32)
        a = jnp.pad(a, ((0, 0), (0, p["kpad"])))
    if residual is None:
        out = _fused_conv_mm(a, p["w"], p["bias"], relu=relu)
    else:
        res = residual.reshape(M, N).astype(jnp.bfloat16)
        out = _fused_conv_mm_res(a, p["w"], p["bias"], res, relu=relu)
    return out.reshape(B, Ho, Wo, N)


# ----------------------------------------------------------------------------
# Deterministic parameter construction (mirrors the PyTorch __init__ shapes)
# ----------------------------------------------------------------------------
class ParamGen:
    def __init__(self, seed=0):
        self.key = jax.random.PRNGKey(seed)

    def next(self):
        self.key, k = jax.random.split(self.key)
        return k


def make_convbn(pg, cin, cout, k, stride, pad, dilation, with_bn=True):
    # replicate convbn(): padding = dilation if dilation > 1 else pad
    actual_pad = dilation if dilation > 1 else pad
    w = jax.random.normal(pg.next(), (k, k, cin, cout), jnp.float32)
    w = w * (1.0 / math.sqrt(k * k * cin))
    if with_bn:
        gamma = 1.0 + 0.1 * jax.random.normal(pg.next(), (cout,), jnp.float32)
        beta = 0.1 * jax.random.normal(pg.next(), (cout,), jnp.float32)
        rmean = 0.1 * jax.random.normal(pg.next(), (cout,), jnp.float32)
        rvar = jnp.abs(1.0 + 0.1 * jax.random.normal(pg.next(), (cout,), jnp.float32))
        eps = 1e-5
        scale = gamma / jnp.sqrt(rvar + eps)
        bias = beta - rmean * scale
    else:
        scale = jnp.ones((cout,), jnp.float32)
        bias = jnp.zeros((cout,), jnp.float32)
    # Fold the BN scale into the weights (eval mode); keep only the bias epilogue.
    w = (w * scale[None, None, None, :]).reshape(k * k * cin, cout)
    K = k * k * cin
    Kp = K if K % 16 == 0 else _round_up(K, 16)
    if Kp > K:
        w = jnp.pad(w, ((0, Kp - K), (0, 0)))
    return dict(w=w.astype(jnp.bfloat16), kh=k, kw=k, stride=stride,
                pad=actual_pad, dil=dilation,
                bias=bias.reshape(1, cout).astype(jnp.float32),
                kpad=Kp - K)


def make_basic_block(pg, inplanes, planes, stride, pad, dilation, with_downsample):
    blk = dict(
        conv1=make_convbn(pg, inplanes, planes, 3, stride, pad, dilation),
        conv2=make_convbn(pg, planes, planes, 3, 1, pad, dilation),
        down=None,
    )
    if with_downsample:
        blk["down"] = make_convbn(pg, inplanes, planes, 1, stride, 0, 1)
    return blk


def make_layer(pg, inplanes, planes, blocks, stride, pad, dilation):
    need_down = (stride != 1) or (inplanes != planes)
    layer = [make_basic_block(pg, inplanes, planes, stride, pad, dilation, need_down)]
    for _ in range(1, blocks):
        layer.append(make_basic_block(pg, planes, planes, 1, pad, dilation, False))
    return layer, planes


def build_params(seed=0):
    pg = ParamGen(seed)
    P = {}
    P["firstconv"] = [
        make_convbn(pg, 3, 32, 3, 2, 1, 1),
        make_convbn(pg, 32, 32, 3, 1, 1, 1),
        make_convbn(pg, 32, 32, 3, 1, 1, 1),
    ]
    inplanes = 32
    P["layer1"], inplanes = make_layer(pg, inplanes, 32, 3, 1, 1, 1)
    P["layer2"], inplanes = make_layer(pg, inplanes, 64, 16, 2, 1, 1)
    P["layer3"], inplanes = make_layer(pg, inplanes, 128, 3, 1, 1, 1)
    P["layer4"], inplanes = make_layer(pg, inplanes, 128, 3, 1, 1, 2)
    P["branch1"] = make_convbn(pg, 128, 32, 1, 1, 0, 1)
    P["branch2"] = make_convbn(pg, 128, 32, 1, 1, 0, 1)
    P["branch3"] = make_convbn(pg, 128, 32, 1, 1, 0, 1)
    P["branch4"] = make_convbn(pg, 128, 32, 1, 1, 0, 1)
    P["lastconv1"] = make_convbn(pg, 320, 128, 3, 1, 1, 1)
    P["lastconv2"] = make_convbn(pg, 128, 32, 1, 1, 0, 1, with_bn=False)
    return P


# ----------------------------------------------------------------------------
# Forward pass
# ----------------------------------------------------------------------------
def basic_block_fwd(x, bp):
    out = conv_bn(x, bp["conv1"], relu=True)
    if bp["down"] is not None:
        skip = conv_bn(x, bp["down"], relu=False)
    else:
        skip = x
    # conv2 + BN + residual add fused in one kernel call (no ReLU, as in PSMNet)
    out = conv_bn(out, bp["conv2"], relu=False, residual=skip)
    return out


def layer_fwd(x, layer):
    for blk in layer:
        x = basic_block_fwd(x, blk)
    return x


def branch_fwd(output_skip, p, pool_k, out_hw):
    B, H, W, C = output_skip.shape
    Hc = (H // pool_k) * pool_k
    Wc = (W // pool_k) * pool_k
    pooled = output_skip[:, :Hc, :Wc, :].astype(jnp.float32).reshape(
        B, Hc // pool_k, pool_k, Wc // pool_k, pool_k, C).mean(axis=(2, 4))
    out = conv_bn(pooled.astype(jnp.bfloat16), p, relu=True)
    # TODO(synk): F.upsample(mode='bilinear') implemented with jax.image.resize
    # (half-pixel / align_corners=False, matching modern torch interpolate).
    out = jax.image.resize(out.astype(jnp.float32),
                           (B, out_hw[0], out_hw[1], out.shape[-1]),
                           method="bilinear")
    return out.astype(jnp.bfloat16)


def feature_extraction_forward(params, x_nchw):
    # NCHW -> NHWC, bf16 activations throughout (f32 accumulation in-kernel)
    x = jnp.transpose(x_nchw, (0, 2, 3, 1)).astype(jnp.bfloat16)

    out = x
    for p in params["firstconv"]:
        out = conv_bn(out, p, relu=True)

    out = layer_fwd(out, params["layer1"])
    output_raw = layer_fwd(out, params["layer2"])
    out = layer_fwd(output_raw, params["layer3"])
    output_skip = layer_fwd(out, params["layer4"])

    Hs, Ws = output_skip.shape[1], output_skip.shape[2]
    b1 = branch_fwd(output_skip, params["branch1"], 64, (Hs, Ws))
    b2 = branch_fwd(output_skip, params["branch2"], 32, (Hs, Ws))
    b3 = branch_fwd(output_skip, params["branch3"], 16, (Hs, Ws))
    b4 = branch_fwd(output_skip, params["branch4"], 8, (Hs, Ws))

    # channel concat order matches torch.cat((raw, skip, b4, b3, b2, b1), dim=1)
    feat = jnp.concatenate([output_raw, output_skip, b4, b3, b2, b1], axis=-1)

    feat = conv_bn(feat, params["lastconv1"], relu=True)
    feat = conv_bn(feat, params["lastconv2"], relu=False)   # final 1x1, no BN/ReLU

    # NHWC -> NCHW, return f32 like the PyTorch module
    return jnp.transpose(feat.astype(jnp.float32), (0, 3, 1, 2))


# ----------------------------------------------------------------------------
if __name__ == "__main__":
    # Smallest input consistent with the module: branch1's AvgPool2d((64,64)) needs
    # the 1/4-resolution feature map to be >= 64, so the image must be >= 256x256.
    B, C, H, W = 1, 3, 256, 256
    key = jax.random.PRNGKey(0)
    x = jax.random.normal(key, (B, C, H, W), jnp.float32)

    params = build_params(seed=0)
    out = feature_extraction_forward(params, x)
    out = jax.block_until_ready(out)

    assert out.shape == (B, 32, H // 4, W // 4), out.shape
    assert bool(jnp.all(jnp.isfinite(out)))
    print("KERNEL_OK")
</pallas_src>

<mosaic_0001>
module attributes {stable_mosaic.version = 11 : i64} {
  func.func @_mm_kernel(%arg0: i32, %arg1: memref<512x32xbf16, #tpu.memory_space<vmem>>, %arg2: memref<32x32xbf16, #tpu.memory_space<vmem>>, %arg3: memref<1x32xf32, #tpu.memory_space<vmem>>, %arg4: memref<512x32xbf16, #tpu.memory_space<vmem>>) attributes {dimension_semantics = [#tpu.dimension_semantics<parallel>], iteration_bounds = array<i64: 32>, scalar_prefetch = 0 : i64, scratch_operands = 0 : i64, tpu.core_type = #tpu.core_type<tc>, window_params = [{transform_indices = @transform_0, window_bounds = array<i64: 512, 32>}, {pipeline_mode = #tpu.pipeline_mode<synchronous>, transform_indices = @transform_1, window_bounds = array<i64: 32, 32>}, {pipeline_mode = #tpu.pipeline_mode<synchronous>, transform_indices = @transform_2, window_bounds = array<i64: 1, 32>}, {transform_indices = @transform_3, window_bounds = array<i64: 512, 32>}]} {
    %c0 = arith.constant 0 : index
    %c0_0 = arith.constant 0 : index
    %0 = vector.load %arg1[%c0, %c0_0] : memref<512x32xbf16, #tpu.memory_space<vmem>>, vector<512x32xbf16>
    %c0_1 = arith.constant 0 : index
    %c0_2 = arith.constant 0 : index
    %1 = vector.load %arg2[%c0_1, %c0_2] : memref<32x32xbf16, #tpu.memory_space<vmem>>, vector<32x32xbf16>
    %cst = arith.constant dense<0.000000e+00> : vector<512x32xf32>
    %2 = tpu.matmul %0, %1, %cst {dimension_numbers = #tpu.dot_dimension_numbers<[1], [0], [0], [1], [0, 0, 1, 1], [], []>} : vector<512x32xbf16>, vector<32x32xbf16>, vector<512x32xf32> -> vector<512x32xf32>
    %c0_3 = arith.constant 0 : index
    %c0_4 = arith.constant 0 : index
    %3 = vector.load %arg3[%c0_3, %c0_4] : memref<1x32xf32, #tpu.memory_space<vmem>>, vector<1x32xf32>
    %4 = vector.broadcast %3 : vector<1x32xf32> to vector<512x32xf32>
    %5 = arith.addf %2, %4 : vector<512x32xf32>
    %cst_5 = arith.constant 0.000000e+00 : f32
    %6 = vector.broadcast %cst_5 : f32 to vector<512x32xf32>
    %7 = arith.maximumf %5, %6 : vector<512x32xf32>
    %8 = arith.truncf %7 : vector<512x32xf32> to vector<512x32xbf16>
    %c0_6 = arith.constant 0 : index
    %c0_7 = arith.constant 0 : index
    %9 = vector.load %arg4[%c0_6, %c0_7] : memref<512x32xbf16, #tpu.memory_space<vmem>>, vector<512x32xbf16>
    tpu.vector_store %arg4[%c0_6, %c0_7], %8 {strides = array<i32>} : memref<512x32xbf16, #tpu.memory_space<vmem>>, vector<512x32xbf16>,
    return
  }
  func.func @transform_0(%arg0: i32) -> (i32, i32) {
    %c0_i32 = arith.constant 0 : i32
    %c0_i32_0 = arith.constant 0 : i32
    return %arg0, %c0_i32 : i32, i32
  }
  func.func @transform_1(%arg0: i32) -> (i32, i32) {
    %c0_i32 = arith.constant 0 : i32
    %c0_i32_0 = arith.constant 0 : i32
    %c0_i32_1 = arith.constant 0 : i32
    return %c0_i32, %c0_i32_0 : i32, i32
  }
  func.func @transform_2(%arg0: i32) -> (i32, i32) {
    %c0_i32 = arith.constant 0 : i32
    %c0_i32_0 = arith.constant 0 : i32
    %c0_i32_1 = arith.constant 0 : i32
    return %c0_i32, %c0_i32_0 : i32, i32
  }
  func.func @transform_3(%arg0: i32) -> (i32, i32) {
    %c0_i32 = arith.constant 0 : i32
    %c0_i32_0 = arith.constant 0 : i32
    return %arg0, %c0_i32 : i32, i32
  }
}

</mosaic_0001>

<bundles_post_ra>
// kernel: _fused_conv_mm.1
= control target key start
LH: loop header
LB: loop body
LE: loop exit
PB: predicated region body
PF: predicated region fallthrough
CT: control target
= control target key end

     0   :  { %s1631_s12 = smov 0   ;;  %s1926_s0 = inlined_call_operand.vmem [shape: bf16[16384,32], index: 0, kind: input, shape index: {}]   ;;  %s1927_s1 = inlined_call_operand.vmem [shape: bf16[32,32], index: 1, kind: input, shape index: {}]   ;;  %s1928_s2 = inlined_call_operand.vmem [shape: f32[1,32], index: 2, kind: input, shape index: {}]   ;;  %s1929_s3 = inlined_call_operand.vmem [shape: bf16[16384,32], index: 3, kind: output, shape index: {}]  }
   0x1 LB: > { %s1249_s13 = sadd.s32 4294967295, %s1609_s12   ;;  %p1253_p0 = scmp.ge.s32.totalorder %s1609_s12, 1  ;;  %s1609_s12 = sphi %s1631_s12, %s13_s12  }
   0x2   : > { %p138_p1 = scmp.lt.s32.totalorder %s1609_s12, 33 }
   0x4   : > { %p139_p2 = pnand %p1253_p0, %p138_p1 }
   0x5   : > { %v1569_v0 = vld [vmem:[%s1927_s1] sm:$0xff] (!%p139_p2)   ;;  %s1254_s16 = sshll.u32 (!%p139_p2), %s1249_s13, 6  ;;  %v1570_v1 = vld [vmem:[%s1927_s1 + $0x8] sm:$0xff] (!%p139_p2)   ;;  %vm422_vm0 = vcmask (!%p139_p2), 261120   ;;  %vm1128_vm1 = vcmask (!%p139_p2), 257024  }
   0x6   : > { %142 = sbr.rel (%p139_p2) target bundleno = 297 (0x129), region = 32  ;;  %p163_p3 = scmp.lt.s32.totalorder (!%p139_p2), %s1254_s16, 2047  ;;  %1489 = vmatprep.subr.bf16.mxu0 (!%p139_p2), %v1569_v0  ;;  %1557 = vmatprep.subr.bf16.mxu1 (!%p139_p2), %v1569_v0  ;;  %v1722_v34 = vld [vmem:[%s1928_s2] ss:$0 sm:$0xff] (!%p139_p2) }
   0x7   : > { %1490 = vmatpush3.bf16.msra.mxu0 (!%p139_p2), %v1569_v0  ;;  %1559 = vmatpush3.bf16.msra.mxu1 (!%p139_p2), %v1569_v0 }
   0x8   : > { %1491 = vmatprep.subr.bf16.mxu0 (!%p139_p2), %v1570_v1  ;;  %1558 = vmatprep.subr.bf16.mxu1 (!%p139_p2), %v1570_v1 }
   0xb   : > { %1492 = vmatpush3.bf16.msra.mxu0 (!%p139_p2), %v1570_v1  ;;  %1560 = vmatpush3.bf16.msra.mxu1 (!%p139_p2), %v1570_v1 }
   0xd   : > { %s1931_s16 = smov (!%p163_p3, %s1254_s16), 2047 }
   0xe   : > { %s1255_s19 = sshll.u32 %s1931_s16, 2 }
   0xf   : > { %s1653_s22 = scalar_lea.vmem %s1926_s0, %s1255_s19  ;;  %s1734_s27 = scalar_lea.vmem %s1929_s3, %s1255_s19 }
  0x10   : > { %v1571_v2 = vld [vmem:[%s1653_s22] sm:$0xff]   ;;  %v1573_v4 = vld [vmem:[%s1653_s22 + $0x8] sm:$0xff]   ;;  %v1575_v6 = vld [vmem:[%s1653_s22 + $0x10] sm:$0xff]  }
  0x11   : > { %v1572_v3 = vld [vmem:[%s1653_s22 + $0x80] sm:$0xff]   ;;  %1493 = vmatprep.mubr.msk.bf16.mxu0 %vm422_vm0, %v1571_v2  ;;  %v1574_v5 = vld [vmem:[%s1653_s22 + $0x88] sm:$0xff]   ;;  %v1576_v7 = vld [vmem:[%s1653_s22 + $0x90] sm:$0xff]  }
  0x12   : > { %1525 = vmatprep.mubr.msk.bf16.mxu1 %vm422_vm0, %v1572_v3  ;;  %1494 = vmatmul.mubr.msk.bf16.vlgmr.msra.gmra.mrb[0].mxu0 %vm422_vm0, %v1573_v4  ;;  %v1577_v8 = vld [vmem:[%s1653_s22 + $0x18] sm:$0xff]   ;;  %v1579_v10 = vld [vmem:[%s1653_s22 + $0x20] sm:$0xff]   ;;  %v1581_v12 = vld [vmem:[%s1653_s22 + $0x28] sm:$0xff]  }
  0x13   : > { %1526 = vmatmul.mubr.msk.bf16.vlgmr.msra.gmra.mrb[0].mxu1 %vm422_vm0, %v1574_v5  ;;  %1497 = vmatprep.mubr.msk.bf16.mxu0 %vm422_vm0, %v1575_v6  ;;  %v1578_v9 = vld [vmem:[%s1653_s22 + $0x98] sm:$0xff]   ;;  %v1580_v11 = vld [vmem:[%s1653_s22 + $0xa0] sm:$0xff]   ;;  %v1582_v13 = vld [vmem:[%s1653_s22 + $0xa8] sm:$0xff]  }
  0x14   : > { %1529 = vmatprep.mubr.msk.bf16.mxu1 %vm422_vm0, %v1576_v7  ;;  %v1583_v14 = vld [vmem:[%s1653_s22 + $0x30] sm:$0xff]   ;;  %v1585_v16 = vld [vmem:[%s1653_s22 + $0x38] sm:$0xff]   ;;  %v1587_v18 = vld [vmem:[%s1653_s22 + $0x40] sm:$0xff]  }
  0x15   : > { %v1584_v15 = vld [vmem:[%s1653_s22 + $0xb0] sm:$0xff]   ;;  %v1586_v17 = vld [vmem:[%s1653_s22 + $0xb8] sm:$0xff]   ;;  %v1588_v19 = vld [vmem:[%s1653_s22 + $0xc0] sm:$0xff]  }
  0x16   : > { %v1589_v20 = vld [vmem:[%s1653_s22 + $0x48] sm:$0xff]   ;;  %v1591_v22 = vld [vmem:[%s1653_s22 + $0x50] sm:$0xff]   ;;  %v1593_v24 = vld [vmem:[%s1653_s22 + $0x58] sm:$0xff]  }
  0x17   : > { %v1590_v21 = vld [vmem:[%s1653_s22 + $0xc8] sm:$0xff]   ;;  %v1592_v23 = vld [vmem:[%s1653_s22 + $0xd0] sm:$0xff]   ;;  %v1594_v25 = vld [vmem:[%s1653_s22 + $0xd8] sm:$0xff]  }
  0x18   : > { %v1595_v26 = vld [vmem:[%s1653_s22 + $0x60] sm:$0xff]   ;;  %v1597_v28 = vld [vmem:[%s1653_s22 + $0x68] sm:$0xff]   ;;  %v1599_v30 = vld [vmem:[%s1653_s22 + $0x70] sm:$0xff]  }
  0x19   : > { %v1596_v27 = vld [vmem:[%s1653_s22 + $0xe0] sm:$0xff]   ;;  %v1598_v29 = vld [vmem:[%s1653_s22 + $0xe8] sm:$0xff]   ;;  %v1600_v31 = vld [vmem:[%s1653_s22 + $0xf0] sm:$0xff]  }
  0x1a   : > { %1498 = vmatmul.mubr.msk.bf16.gmra.mrb[4].mxu0 %vm422_vm0, %v1577_v8  ;;  %v1601_v32 = vld [vmem:[%s1653_s22 + $0x78] sm:$0xff]  }
  0x1b   : > { %1530 = vmatmul.mubr.msk.bf16.gmra.mrb[4].mxu1 %vm422_vm0, %v1578_v9  ;;  %1501 = vmatprep.mubr.msk.bf16.mxu0 %vm422_vm0, %v1579_v10  ;;  %v1602_v33 = vld [vmem:[%s1653_s22 + $0xf8] sm:$0xff]  }
  0x1c   : > { %1533 = vmatprep.mubr.msk.bf16.mxu1 %vm422_vm0, %v1580_v11 }
  0x22   : > { %1502 = vmatmul.mubr.msk.bf16.gmra.mrb[8].mxu0 %vm422_vm0, %v1581_v12 }
  0x23   : > { %1534 = vmatmul.mubr.msk.bf16.gmra.mrb[8].mxu1 %vm422_vm0, %v1582_v13  ;;  %1505 = vmatprep.mubr.msk.bf16.mxu0 %vm422_vm0, %v1583_v14 }
  0x24   : > { %1537 = vmatprep.mubr.msk.bf16.mxu1 %vm422_vm0, %v1584_v15 }
  0x2a   : > { %1506 = vmatmul.mubr.msk.bf16.gmra.mrb[12].mxu0 %vm422_vm0, %v1585_v16 }
  0x2b   : > { %1538 = vmatmul.mubr.msk.bf16.gmra.mrb[12].mxu1 %vm422_vm0, %v1586_v17  ;;  %1509 = vmatprep.mubr.msk.bf16.mxu0 %vm422_vm0, %v1587_v18 }
  0x2c   : > { %1541 = vmatprep.mubr.msk.bf16.mxu1 %vm422_vm0, %v1588_v19 }
  0x32   : > { %1510 = vmatmul.mubr.msk.bf16.gmra.mrb[16].mxu0 %vm422_vm0, %v1589_v20 }
  0x33   : > { %1542 = vmatmul.mubr.msk.bf16.gmra.mrb[16].mxu1 %vm422_vm0, %v1590_v21  ;;  %1513 = vmatprep.mubr.msk.bf16.mxu0 %vm422_vm0, %v1591_v22 }
  0x34   : > { %1545 = vmatprep.mubr.msk.bf16.mxu1 %vm422_vm0, %v1592_v23 }
  0x3a   : > { %1514 = vmatmul.mubr.msk.bf16.gmra.mrb[20].mxu0 %vm422_vm0, %v1593_v24 }
  0x3b   : > { %1546 = vmatmul.mubr.msk.bf16.gmra.mrb[20].mxu1 %vm422_vm0, %v1594_v25  ;;  %1517 = vmatprep.mubr.msk.bf16.mxu0 %vm422_vm0, %v1595_v26 }
  0x3c   : > { %1549 = vmatprep.mubr.msk.bf16.mxu1 %vm422_vm0, %v1596_v27 }
  0x42   : > { %1518 = vmatmul.mubr.msk.bf16.gmra.mrb[24].mxu0 %vm422_vm0, %v1597_v28 }
  0x43   : > { %1550 = vmatmul.mubr.msk.bf16.gmra.mrb[24].mxu1 %vm422_vm0, %v1598_v29  ;;  %1521 = vmatprep.mubr.msk.bf16.mxu0 %vm422_vm0, %v1599_v30 }
  0x44   : > { %1553 = vmatprep.mubr.msk.bf16.mxu1 %vm422_vm0, %v1600_v31 }
  0x4a   : > { %1522 = vmatmul.mubr.msk.bf16.gmra.mrb[28].mxu0 %vm422_vm0, %v1601_v32 }
  0x4b   : > { %1554 = vmatmul.mubr.msk.bf16.gmra.mrb[28].mxu1 %vm422_vm0, %v1602_v33 }
  0xe5   : > { %v1495_v35 = vpop.f32.mrb[0].mxu0 }
  0xe6   : > { %v562_v36 = vadd.f32 %v1495_v35, %v1722_v34  ;;  %v1527_v37 = vpop.f32.mrb[0].mxu1  ;;  %v553_v38 = vpop.f32.mrb[1].mxu0 }
  0xe7   : > { %v690_v39 = vadd.f32 %v1527_v37, %v1722_v34  ;;  %v554_v40 = vadd.f32 %v1722_v34, %v553_v38  ;;  %v681_v41 = vpop.f32.mrb[1].mxu1  ;;  %v1496_v42 = vpop.f32.mrb[2].mxu0 }
  0xe8   : > { %v810_v43 = vmax.f32 %v562_v36, 0.0  ;;  %v682_v44 = vadd.f32 %v1722_v34, %v681_v41  ;;  %v565_v45 = vadd.f32 %v1496_v42, %v1722_v34  ;;  %v1528_v46 = vpop.f32.mrb[2].mxu1  ;;  %v556_v47 = vpop.f32.mrb[3].mxu0 }
  0xe9   : > { %v842_v48 = vmax.f32 %v690_v39, 0.0  ;;  %v808_v49 = vmax.f32 %v554_v40, 0.0  ;;  %v693_v50 = vadd.f32 %v1528_v46, %v1722_v34  ;;  %v557_v51 = vadd.f32 %v1722_v34, %v556_v47  ;;  %v684_v52 = vpop.f32.mrb[3].mxu1 }
  0xea   : > { %v1393_v53 = vpack.c.bf16 %v810_v43, %v810_v43  ;;  %v840_v54 = vmax.f32 %v682_v44, 0.0  ;;  %v811_v55 = vmax.f32 %v565_v45, 0.0  ;;  %v685_v56 = vadd.f32 %v1722_v34, %v684_v52 }
  0xeb   : > { %v1425_v57 = vpack.c.bf16 %v842_v48, %v842_v48  ;;  %v1391_v58 = vpack.c.bf16 %v808_v49, %v808_v49  ;;  %v843_v59 = vmax.f32 %v693_v50, 0.0  ;;  %v809_v60 = vmax.f32 %v557_v51, 0.0 }
  0xec   : > { %1131 = vst.msk [vmem:[%s1734_s27 + $0x8] sm:$0xf] %vm1128_vm1, %v1393_v53  ;;  %v1423_v61 = vpack.c.bf16 %v840_v54, %v840_v54  ;;  %v1394_v62 = vpack.c.bf16 %v811_v55, %v811_v55  ;;  %v841_v63 = vmax.f32 %v685_v56, 0.0 }
  0xed   : > { %1163 = vst.msk [vmem:[%s1734_s27 + $0x88] sm:$0xf] %vm1128_vm1, %v1425_v57  ;;  %1129 = vst.msk [vmem:[%s1734_s27] sm:$0xf] %vm1128_vm1, %v1391_v58  ;;  %v1426_v0 = vpack.c.bf16 %v843_v59, %v843_v59  ;;  %v1392_v1 = vpack.c.bf16 %v809_v60, %v809_v60  ;;  %v1499_v2 = vpop.f32.mrb[4].mxu0 }
  0xee   : > { %1161 = vst.msk [vmem:[%s1734_s27 + $0x80] sm:$0xf] %vm1128_vm1, %v1423_v61  ;;  %1132 = vst.msk [vmem:[%s1734_s27 + $0xc] sm:$0xf] %vm1128_vm1, %v1394_v62  ;;  %v1424_v3 = vpack.c.bf16 %v841_v63, %v841_v63  ;;  %v578_v4 = vadd.f32 %v1499_v2, %v1722_v34  ;;  %v1531_v5 = vpop.f32.mrb[4].mxu1  ;;  %v569_v6 = vpop.f32.mrb[5].mxu0 }
  0xef   : > { %1164 = vst.msk [vmem:[%s1734_s27 + $0x8c] sm:$0xf] %vm1128_vm1, %v1426_v0  ;;  %1130 = vst.msk [vmem:[%s1734_s27 + $0x4] sm:$0xf] %vm1128_vm1, %v1392_v1  ;;  %v706_v7 = vadd.f32 %v1531_v5, %v1722_v34  ;;  %v570_v8 = vadd.f32 %v1722_v34, %v569_v6  ;;  %v697_v9 = vpop.f32.mrb[5].mxu1  ;;  %v1500_v10 = vpop.f32.mrb[6].mxu0 }
  0xf0   : > { %1162 = vst.msk [vmem:[%s1734_s27 + $0x84] sm:$0xf] %vm1128_vm1, %v1424_v3  ;;  %v814_v11 = vmax.f32 %v578_v4, 0.0  ;;  %v698_v12 = vadd.f32 %v1722_v34, %v697_v9  ;;  %v581_v13 = vadd.f32 %v1500_v10, %v1722_v34  ;;  %v1532_v14 = vpop.f32.mrb[6].mxu1  ;;  %v572_v15 = vpop.f32.mrb[7].mxu0 }
  0xf1   : > { %v846_v16 = vmax.f32 %v706_v7, 0.0  ;;  %v812_v17 = vmax.f32 %v570_v8, 0.0  ;;  %v709_v18 = vadd.f32 %v1532_v14, %v1722_v34  ;;  %v573_v19 = vadd.f32 %v1722_v34, %v572_v15  ;;  %v700_v20 = vpop.f32.mrb[7].mxu1 }
  0xf2   : > { %v1397_v21 = vpack.c.bf16 %v814_v11, %v814_v11  ;;  %v844_v22 = vmax.f32 %v698_v12, 0.0  ;;  %v815_v23 = vmax.f32 %v581_v13, 0.0  ;;  %v701_v24 = vadd.f32 %v1722_v34, %v700_v20 }
  0xf3   : > { %v1429_v25 = vpack.c.bf16 %v846_v16, %v846_v16  ;;  %v1395_v26 = vpack.c.bf16 %v812_v17, %v812_v17  ;;  %v847_v27 = vmax.f32 %v709_v18, 0.0  ;;  %v813_v28 = vmax.f32 %v573_v19, 0.0 }
  0xf4   : > { %1135 = vst.msk [vmem:[%s1734_s27 + $0x18] sm:$0xf] %vm1128_vm1, %v1397_v21  ;;  %v1427_v29 = vpack.c.bf16 %v844_v22, %v844_v22  ;;  %v1398_v30 = vpack.c.bf16 %v815_v23, %v815_v23  ;;  %v845_v31 = vmax.f32 %v701_v24, 0.0 }
  0xf5   : > { %1167 = vst.msk [vmem:[%s1734_s27 + $0x98] sm:$0xf] %vm1128_vm1, %v1429_v25  ;;  %1133 = vst.msk [vmem:[%s1734_s27 + $0x10] sm:$0xf] %vm1128_vm1, %v1395_v26  ;;  %v1430_v32 = vpack.c.bf16 %v847_v27, %v847_v27  ;;  %v1396_v33 = vpack.c.bf16 %v813_v28, %v813_v28  ;;  %v1503_v35 = vpop.f32.mrb[8].mxu0 }
  0xf6   : > { %1165 = vst.msk [vmem:[%s1734_s27 + $0x90] sm:$0xf] %vm1128_vm1, %v1427_v29  ;;  %1136 = vst.msk [vmem:[%s1734_s27 + $0x1c] sm:$0xf] %vm1128_vm1, %v1398_v30  ;;  %v1428_v36 = vpack.c.bf16 %v845_v31, %v845_v31  ;;  %v594_v37 = vadd.f32 %v1503_v35, %v1722_v34  ;;  %v1535_v38 = vpop.f32.mrb[8].mxu1  ;;  %v585_v39 = vpop.f32.mrb[9].mxu0 }
  0xf7   : > { %1168 = vst.msk [vmem:[%s1734_s27 + $0x9c] sm:$0xf] %vm1128_vm1, %v1430_v32  ;;  %1134 = vst.msk [vmem:[%s1734_s27 + $0x14] sm:$0xf] %vm1128_vm1, %v1396_v33  ;;  %v722_v40 = vadd.f32 %v1535_v38, %v1722_v34  ;;  %v586_v41 = vadd.f32 %v1722_v34, %v585_v39  ;;  %v713_v42 = vpop.f32.mrb[9].mxu1  ;;  %v1504_v43 = vpop.f32.mrb[10].mxu0 }
  0xf8   : > { %1166 = vst.msk [vmem:[%s1734_s27 + $0x94] sm:$0xf] %vm1128_vm1, %v1428_v36  ;;  %v818_v44 = vmax.f32 %v594_v37, 0.0  ;;  %v714_v45 = vadd.f32 %v1722_v34, %v713_v42  ;;  %v597_v46 = vadd.f32 %v1504_v43, %v1722_v34  ;;  %v1536_v47 = vpop.f32.mrb[10].mxu1  ;;  %v588_v48 = vpop.f32.mrb[11].mxu0 }
  0xf9   : > { %v850_v49 = vmax.f32 %v722_v40, 0.0  ;;  %v816_v50 = vmax.f32 %v586_v41, 0.0  ;;  %v725_v51 = vadd.f32 %v1536_v47, %v1722_v34  ;;  %v589_v52 = vadd.f32 %v1722_v34, %v588_v48  ;;  %v716_v53 = vpop.f32.mrb[11].mxu1 }
  0xfa   : > { %v1401_v54 = vpack.c.bf16 %v818_v44, %v818_v44  ;;  %v848_v55 = vmax.f32 %v714_v45, 0.0  ;;  %v819_v56 = vmax.f32 %v597_v46, 0.0  ;;  %v717_v57 = vadd.f32 %v1722_v34, %v716_v53 }
  0xfb   : > { %v1433_v58 = vpack.c.bf16 %v850_v49, %v850_v49  ;;  %v1399_v59 = vpack.c.bf16 %v816_v50, %v816_v50  ;;  %v851_v60 = vmax.f32 %v725_v51, 0.0  ;;  %v817_v61 = vmax.f32 %v589_v52, 0.0 }
  0xfc   : > { %1139 = vst.msk [vmem:[%s1734_s27 + $0x28] sm:$0xf] %vm1128_vm1, %v1401_v54  ;;  %v1431_v62 = vpack.c.bf16 %v848_v55, %v848_v55  ;;  %v1402_v63 = vpack.c.bf16 %v819_v56, %v819_v56  ;;  %v849_v0 = vmax.f32 %v717_v57, 0.0 }
  0xfd   : > { %1171 = vst.msk [vmem:[%s1734_s27 + $0xa8] sm:$0xf] %vm1128_vm1, %v1433_v58  ;;  %1137 = vst.msk [vmem:[%s1734_s27 + $0x20] sm:$0xf] %vm1128_vm1, %v1399_v59  ;;  %v1434_v1 = vpack.c.bf16 %v851_v60, %v851_v60  ;;  %v1400_v2 = vpack.c.bf16 %v817_v61, %v817_v61  ;;  %v1507_v3 = vpop.f32.mrb[12].mxu0 }
  0xfe   : > { %1169 = vst.msk [vmem:[%s1734_s27 + $0xa0] sm:$0xf] %vm1128_vm1, %v1431_v62  ;;  %1140 = vst.msk [vmem:[%s1734_s27 + $0x2c] sm:$0xf] %vm1128_vm1, %v1402_v63  ;;  %v1432_v4 = vpack.c.bf16 %v849_v0, %v849_v0  ;;  %v610_v5 = vadd.f32 %v1507_v3, %v1722_v34  ;;  %v1539_v6 = vpop.f32.mrb[12].mxu1  ;;  %v601_v7 = vpop.f32.mrb[13].mxu0 }
  0xff   : > { %1172 = vst.msk [vmem:[%s1734_s27 + $0xac] sm:$0xf] %vm1128_vm1, %v1434_v1  ;;  %1138 = vst.msk [vmem:[%s1734_s27 + $0x24] sm:$0xf] %vm1128_vm1, %v1400_v2  ;;  %v738_v8 = vadd.f32 %v1539_v6, %v1722_v34  ;;  %v602_v9 = vadd.f32 %v1722_v34, %v601_v7  ;;  %v729_v10 = vpop.f32.mrb[13].mxu1  ;;  %v1508_v11 = vpop.f32.mrb[14].mxu0 }
 0x100   : > { %1170 = vst.msk [vmem:[%s1734_s27 + $0xa4] sm:$0xf] %vm1128_vm1, %v1432_v4  ;;  %v822_v12 = vmax.f32 %v610_v5, 0.0  ;;  %v730_v13 = vadd.f32 %v1722_v34, %v729_v10  ;;  %v613_v14 = vadd.f32 %v1508_v11, %v1722_v34  ;;  %v1540_v15 = vpop.f32.mrb[14].mxu1  ;;  %v604_v16 = vpop.f32.mrb[15].mxu0 }
 0x101   : > { %v854_v17 = vmax.f32 %v738_v8, 0.0  ;;  %v820_v18 = vmax.f32 %v602_v9, 0.0  ;;  %v741_v19 = vadd.f32 %v1540_v15, %v1722_v34  ;;  %v605_v20 = vadd.f32 %v1722_v34, %v604_v16  ;;  %v732_v21 = vpop.f32.mrb[15].mxu1 }
 0x102   : > { %v1405_v22 = vpack.c.bf16 %v822_v12, %v822_v12  ;;  %v852_v23 = vmax.f32 %v730_v13, 0.0  ;;  %v823_v24 = vmax.f32 %v613_v14, 0.0  ;;  %v733_v25 = vadd.f32 %v1722_v34, %v732_v21 }
 0x103   : > { %v1437_v26 = vpack.c.bf16 %v854_v17, %v854_v17  ;;  %v1403_v27 = vpack.c.bf16 %v820_v18, %v820_v18  ;;  %v855_v28 = vmax.f32 %v741_v19, 0.0  ;;  %v821_v29 = vmax.f32 %v605_v20, 0.0 }
 0x104   : > { %1143 = vst.msk [vmem:[%s1734_s27 + $0x38] sm:$0xf] %vm1128_vm1, %v1405_v22  ;;  %v1435_v30 = vpack.c.bf16 %v852_v23, %v852_v23  ;;  %v1406_v31 = vpack.c.bf16 %v823_v24, %v823_v24  ;;  %v853_v32 = vmax.f32 %v733_v25, 0.0 }
 0x105   : > { %1175 = vst.msk [vmem:[%s1734_s27 + $0xb8] sm:$0xf] %vm1128_vm1, %v1437_v26  ;;  %1141 = vst.msk [vmem:[%s1734_s27 + $0x30] sm:$0xf] %vm1128_vm1, %v1403_v27  ;;  %v1438_v33 = vpack.c.bf16 %v855_v28, %v855_v28  ;;  %v1404_v35 = vpack.c.bf16 %v821_v29, %v821_v29  ;;  %v1511_v36 = vpop.f32.mrb[16].mxu0 }
 0x106   : > { %1173 = vst.msk [vmem:[%s1734_s27 + $0xb0] sm:$0xf] %vm1128_vm1, %v1435_v30  ;;  %1144 = vst.msk [vmem:[%s1734_s27 + $0x3c] sm:$0xf] %vm1128_vm1, %v1406_v31  ;;  %v1436_v37 = vpack.c.bf16 %v853_v32, %v853_v32  ;;  %v626_v38 = vadd.f32 %v1511_v36, %v1722_v34  ;;  %v1543_v39 = vpop.f32.mrb[16].mxu1  ;;  %v617_v40 = vpop.f32.mrb[17].mxu0 }
 0x107   : > { %1176 = vst.msk [vmem:[%s1734_s27 + $0xbc] sm:$0xf] %vm1128_vm1, %v1438_v33  ;;  %1142 = vst.msk [vmem:[%s1734_s27 + $0x34] sm:$0xf] %vm1128_vm1, %v1404_v35  ;;  %v754_v41 = vadd.f32 %v1543_v39, %v1722_v34  ;;  %v618_v42 = vadd.f32 %v1722_v34, %v617_v40  ;;  %v745_v43 = vpop.f32.mrb[17].mxu1  ;;  %v1512_v44 = vpop.f32.mrb[18].mxu0 }
 0x108   : > { %1174 = vst.msk [vmem:[%s1734_s27 + $0xb4] sm:$0xf] %vm1128_vm1, %v1436_v37  ;;  %v826_v45 = vmax.f32 %v626_v38, 0.0  ;;  %v746_v46 = vadd.f32 %v1722_v34, %v745_v43  ;;  %v629_v47 = vadd.f32 %v1512_v44, %v1722_v34  ;;  %v1544_v48 = vpop.f32.mrb[18].mxu1  ;;  %v620_v49 = vpop.f32.mrb[19].mxu0 }
 0x109   : > { %v858_v50 = vmax.f32 %v754_v41, 0.0  ;;  %v824_v51 = vmax.f32 %v618_v42, 0.0  ;;  %v757_v52 = vadd.f32 %v1544_v48, %v1722_v34  ;;  %v621_v53 = vadd.f32 %v1722_v34, %v620_v49  ;;  %v748_v54 = vpop.f32.mrb[19].mxu1 }
 0x10a   : > { %v1409_v55 = vpack.c.bf16 %v826_v45, %v826_v45  ;;  %v856_v56 = vmax.f32 %v746_v46, 0.0  ;;  %v827_v57 = vmax.f32 %v629_v47, 0.0  ;;  %v749_v58 = vadd.f32 %v1722_v34, %v748_v54 }
 0x10b   : > { %v1441_v59 = vpack.c.bf16 %v858_v50, %v858_v50  ;;  %v1407_v60 = vpack.c.bf16 %v824_v51, %v824_v51  ;;  %v859_v61 = vmax.f32 %v757_v52, 0.0  ;;  %v825_v62 = vmax.f32 %v621_v53, 0.0 }
 0x10c   : > { %1147 = vst.msk [vmem:[%s1734_s27 + $0x48] sm:$0xf] %vm1128_vm1, %v1409_v55  ;;  %v1439_v63 = vpack.c.bf16 %v856_v56, %v856_v56  ;;  %v1410_v0 = vpack.c.bf16 %v827_v57, %v827_v57  ;;  %v857_v1 = vmax.f32 %v749_v58, 0.0 }
 0x10d   : > { %1179 = vst.msk [vmem:[%s1734_s27 + $0xc8] sm:$0xf] %vm1128_vm1, %v1441_v59  ;;  %1145 = vst.msk [vmem:[%s1734_s27 + $0x40] sm:$0xf] %vm1128_vm1, %v1407_v60  ;;  %v1442_v2 = vpack.c.bf16 %v859_v61, %v859_v61  ;;  %v1408_v3 = vpack.c.bf16 %v825_v62, %v825_v62  ;;  %v1515_v4 = vpop.f32.mrb[20].mxu0 }
 0x10e   : > { %1177 = vst.msk [vmem:[%s1734_s27 + $0xc0] sm:$0xf] %vm1128_vm1, %v1439_v63  ;;  %1148 = vst.msk [vmem:[%s1734_s27 + $0x4c] sm:$0xf] %vm1128_vm1, %v1410_v0  ;;  %v1440_v5 = vpack.c.bf16 %v857_v1, %v857_v1  ;;  %v642_v6 = vadd.f32 %v1515_v4, %v1722_v34  ;;  %v1547_v7 = vpop.f32.mrb[20].mxu1  ;;  %v633_v8 = vpop.f32.mrb[21].mxu0 }
 0x10f   : > { %1180 = vst.msk [vmem:[%s1734_s27 + $0xcc] sm:$0xf] %vm1128_vm1, %v1442_v2  ;;  %1146 = vst.msk [vmem:[%s1734_s27 + $0x44] sm:$0xf] %vm1128_vm1, %v1408_v3  ;;  %v770_v9 = vadd.f32 %v1547_v7, %v1722_v34  ;;  %v634_v10 = vadd.f32 %v1722_v34, %v633_v8  ;;  %v761_v11 = vpop.f32.mrb[21].mxu1  ;;  %v1516_v12 = vpop.f32.mrb[22].mxu0 }
 0x110   : > { %1178 = vst.msk [vmem:[%s1734_s27 + $0xc4] sm:$0xf] %vm1128_vm1, %v1440_v5  ;;  %v830_v13 = vmax.f32 %v642_v6, 0.0  ;;  %v762_v14 = vadd.f32 %v1722_v34, %v761_v11  ;;  %v645_v15 = vadd.f32 %v1516_v12, %v1722_v34  ;;  %v1548_v16 = vpop.f32.mrb[22].mxu1  ;;  %v636_v17 = vpop.f32.mrb[23].mxu0 }
 0x111   : > { %v862_v18 = vmax.f32 %v770_v9, 0.0  ;;  %v828_v19 = vmax.f32 %v634_v10, 0.0  ;;  %v773_v20 = vadd.f32 %v1548_v16, %v1722_v34  ;;  %v637_v21 = vadd.f32 %v1722_v34, %v636_v17  ;;  %v764_v22 = vpop.f32.mrb[23].mxu1 }
 0x112   : > { %v1413_v23 = vpack.c.bf16 %v830_v13, %v830_v13  ;;  %v860_v24 = vmax.f32 %v762_v14, 0.0  ;;  %v831_v25 = vmax.f32 %v645_v15, 0.0  ;;  %v765_v26 = vadd.f32 %v1722_v34, %v764_v22 }
 0x113   : > { %v1445_v27 = vpack.c.bf16 %v862_v18, %v862_v18  ;;  %v1411_v28 = vpack.c.bf16 %v828_v19, %v828_v19  ;;  %v863_v29 = vmax.f32 %v773_v20, 0.0  ;;  %v829_v30 = vmax.f32 %v637_v21, 0.0 }
 0x114   : > { %1151 = vst.msk [vmem:[%s1734_s27 + $0x58] sm:$0xf] %vm1128_vm1, %v1413_v23  ;;  %v1443_v31 = vpack.c.bf16 %v860_v24, %v860_v24  ;;  %v1414_v32 = vpack.c.bf16 %v831_v25, %v831_v25  ;;  %v861_v33 = vmax.f32 %v765_v26, 0.0 }
 0x115   : > { %1183 = vst.msk [vmem:[%s1734_s27 + $0xd8] sm:$0xf] %vm1128_vm1, %v1445_v27  ;;  %1149 = vst.msk [vmem:[%s1734_s27 + $0x50] sm:$0xf] %vm1128_vm1, %v1411_v28  ;;  %v1446_v35 = vpack.c.bf16 %v863_v29, %v863_v29  ;;  %v1412_v36 = vpack.c.bf16 %v829_v30, %v829_v30  ;;  %v1519_v37 = vpop.f32.mrb[24].mxu0 }
 0x116   : > { %1181 = vst.msk [vmem:[%s1734_s27 + $0xd0] sm:$0xf] %vm1128_vm1, %v1443_v31  ;;  %1152 = vst.msk [vmem:[%s1734_s27 + $0x5c] sm:$0xf] %vm1128_vm1, %v1414_v32  ;;  %v1444_v38 = vpack.c.bf16 %v861_v33, %v861_v33  ;;  %v658_v39 = vadd.f32 %v1519_v37, %v1722_v34  ;;  %v1551_v40 = vpop.f32.mrb[24].mxu1  ;;  %v649_v41 = vpop.f32.mrb[25].mxu0 }
 0x117   : > { %1184 = vst.msk [vmem:[%s1734_s27 + $0xdc] sm:$0xf] %vm1128_vm1, %v1446_v35  ;;  %1150 = vst.msk [vmem:[%s1734_s27 + $0x54] sm:$0xf] %vm1128_vm1, %v1412_v36  ;;  %v786_v42 = vadd.f32 %v1551_v40, %v1722_v34  ;;  %v650_v43 = vadd.f32 %v1722_v34, %v649_v41  ;;  %v777_v44 = vpop.f32.mrb[25].mxu1  ;;  %v1520_v45 = vpop.f32.mrb[26].mxu0 }
 0x118   : > { %1182 = vst.msk [vmem:[%s1734_s27 + $0xd4] sm:$0xf] %vm1128_vm1, %v1444_v38  ;;  %v834_v46 = vmax.f32 %v658_v39, 0.0  ;;  %v778_v47 = vadd.f32 %v1722_v34, %v777_v44  ;;  %v661_v48 = vadd.f32 %v1520_v45, %v1722_v34  ;;  %v1552_v49 = vpop.f32.mrb[26].mxu1  ;;  %v652_v50 = vpop.f32.mrb[27].mxu0 }
 0x119   : > { %v866_v51 = vmax.f32 %v786_v42, 0.0  ;;  %v832_v52 = vmax.f32 %v650_v43, 0.0  ;;  %v789_v53 = vadd.f32 %v1552_v49, %v1722_v34  ;;  %v653_v54 = vadd.f32 %v1722_v34, %v652_v50  ;;  %v780_v55 = vpop.f32.mrb[27].mxu1 }
 0x11a   : > { %v1417_v56 = vpack.c.bf16 %v834_v46, %v834_v46  ;;  %v864_v57 = vmax.f32 %v778_v47, 0.0  ;;  %v835_v58 = vmax.f32 %v661_v48, 0.0  ;;  %v781_v59 = vadd.f32 %v1722_v34, %v780_v55 }
 0x11b   : > { %v1449_v60 = vpack.c.bf16 %v866_v51, %v866_v51  ;;  %v1415_v61 = vpack.c.bf16 %v832_v52, %v832_v52  ;;  %v867_v62 = vmax.f32 %v789_v53, 0.0  ;;  %v833_v63 = vmax.f32 %v653_v54, 0.0 }
 0x11c   : > { %1155 = vst.msk [vmem:[%s1734_s27 + $0x68] sm:$0xf] %vm1128_vm1, %v1417_v56  ;;  %v1447_v0 = vpack.c.bf16 %v864_v57, %v864_v57  ;;  %v1418_v1 = vpack.c.bf16 %v835_v58, %v835_v58  ;;  %v865_v2 = vmax.f32 %v781_v59, 0.0 }
 0x11d   : > { %1187 = vst.msk [vmem:[%s1734_s27 + $0xe8] sm:$0xf] %vm1128_vm1, %v1449_v60  ;;  %1153 = vst.msk [vmem:[%s1734_s27 + $0x60] sm:$0xf] %vm1128_vm1, %v1415_v61  ;;  %v1450_v3 = vpack.c.bf16 %v867_v62, %v867_v62  ;;  %v1416_v4 = vpack.c.bf16 %v833_v63, %v833_v63  ;;  %v1523_v5 = vpop.f32.mrb[28].mxu0 }
 0x11e   : > { %1185 = vst.msk [vmem:[%s1734_s27 + $0xe0] sm:$0xf] %vm1128_vm1, %v1447_v0  ;;  %1156 = vst.msk [vmem:[%s1734_s27 + $0x6c] sm:$0xf] %vm1128_vm1, %v1418_v1  ;;  %v1448_v6 = vpack.c.bf16 %v865_v2, %v865_v2  ;;  %v674_v7 = vadd.f32 %v1523_v5, %v1722_v34  ;;  %v1555_v8 = vpop.f32.mrb[28].mxu1  ;;  %v665_v9 = vpop.f32.mrb[29].mxu0 }
 0x11f   : > { %1188 = vst.msk [vmem:[%s1734_s27 + $0xec] sm:$0xf] %vm1128_vm1, %v1450_v3  ;;  %1154 = vst.msk [vmem:[%s1734_s27 + $0x64] sm:$0xf] %vm1128_vm1, %v1416_v4  ;;  %v802_v10 = vadd.f32 %v1555_v8, %v1722_v34  ;;  %v666_v11 = vadd.f32 %v1722_v34, %v665_v9  ;;  %v793_v12 = vpop.f32.mrb[29].mxu1  ;;  %v1524_v13 = vpop.f32.mrb[30].mxu0 }
 0x120   : > { %1186 = vst.msk [vmem:[%s1734_s27 + $0xe4] sm:$0xf] %vm1128_vm1, %v1448_v6  ;;  %v838_v14 = vmax.f32 %v674_v7, 0.0  ;;  %v794_v15 = vadd.f32 %v1722_v34, %v793_v12  ;;  %v677_v16 = vadd.f32 %v1524_v13, %v1722_v34  ;;  %v1556_v17 = vpop.f32.mrb[30].mxu1  ;;  %v668_v18 = vpop.f32.mrb[31].mxu0 }
 0x121   : > { %v870_v19 = vmax.f32 %v802_v10, 0.0  ;;  %v836_v20 = vmax.f32 %v666_v11, 0.0  ;;  %v805_v21 = vadd.f32 %v1556_v17, %v1722_v34  ;;  %v669_v22 = vadd.f32 %v1722_v34, %v668_v18  ;;  %v796_v23 = vpop.f32.mrb[31].mxu1 }
 0x122   : > { %v1421_v24 = vpack.c.bf16 %v838_v14, %v838_v14  ;;  %v868_v25 = vmax.f32 %v794_v15, 0.0  ;;  %v839_v26 = vmax.f32 %v677_v16, 0.0  ;;  %v797_v27 = vadd.f32 %v1722_v34, %v796_v23 }
 0x123   : > { %v1453_v28 = vpack.c.bf16 %v870_v19, %v870_v19  ;;  %v1419_v29 = vpack.c.bf16 %v836_v20, %v836_v20  ;;  %v871_v30 = vmax.f32 %v805_v21, 0.0  ;;  %v837_v31 = vmax.f32 %v669_v22, 0.0 }
 0x124   : > { %1159 = vst.msk [vmem:[%s1734_s27 + $0x78] sm:$0xf] %vm1128_vm1, %v1421_v24  ;;  %v1451_v32 = vpack.c.bf16 %v868_v25, %v868_v25  ;;  %v1422_v33 = vpack.c.bf16 %v839_v26, %v839_v26  ;;  %v869_v35 = vmax.f32 %v797_v27, 0.0 }
 0x125   : > { %1191 = vst.msk [vmem:[%s1734_s27 + $0xf8] sm:$0xf] %vm1128_vm1, %v1453_v28  ;;  %1157 = vst.msk [vmem:[%s1734_s27 + $0x70] sm:$0xf] %vm1128_vm1, %v1419_v29  ;;  %v1454_v36 = vpack.c.bf16 %v871_v30, %v871_v30  ;;  %v1420_v37 = vpack.c.bf16 %v837_v31, %v837_v31 }
 0x126   : > { %1189 = vst.msk [vmem:[%s1734_s27 + $0xf0] sm:$0xf] %vm1128_vm1, %v1451_v32  ;;  %1160 = vst.msk [vmem:[%s1734_s27 + $0x7c] sm:$0xf] %vm1128_vm1, %v1422_v33  ;;  %v1452_v34 = vpack.c.bf16 %v869_v35, %v869_v35 }
 0x127   : > { %1192 = vst.msk [vmem:[%s1734_s27 + $0xfc] sm:$0xf] %vm1128_vm1, %v1454_v36  ;;  %1158 = vst.msk [vmem:[%s1734_s27 + $0x74] sm:$0xf] %vm1128_vm1, %v1420_v37 }
 0x128   : > { %1190 = vst.msk [vmem:[%s1734_s27 + $0xf4] sm:$0xf] %vm1128_vm1, %v1452_v34 }
 0x129 PF: > { %s13_s12 = sadd.s32 1, %s1609_s12  }
 0x12a   : > { %p10_p4 = scmp.ge.s32.totalorder %s13_s12, 34  }
 0x12c   :  { %12 = sbr.rel (!%p10_p4) target bundleno = 1 (0x1), region = 62 }

</bundles_post_ra>
